<compile_context>
chip_gen: v7x
topology: tpu7x:2x2x1
jax: 0.10.0
libtpu: 0.0.40
codegen_flags: <defaults>
</compile_context>

<pallas_src>
import jax
import jax.numpy as jnp
from jax.experimental import pallas as pl
from jax.experimental.pallas import tpu as pltpu


def lfm_kernel(u_idx_ref, it_idx_ref, users_wt_ref, items_wt_ref, o_ref):
    # u_idx_ref   : (1, 1, TBN) int32  VMEM  (user id repeated N times per row)
    # it_idx_ref  : (1, 1, TBN) int32  VMEM
    # users_wt_ref: (E, NU)     bf16   VMEM  (transposed table, resident)
    # items_wt_ref: (E, NI)     bf16   VMEM  (transposed table, resident)
    # o_ref       : (1, 1, TBN) f32    lane-dense flat output block
    e, nu = users_wt_ref.shape
    _, ni = items_wt_ref.shape
    w_dtype = items_wt_ref.dtype

    u_idx = u_idx_ref[0]      # (1, TBN) int32, row layout (1 sublane x TBN lanes)
    it_idx = it_idx_ref[0]    # (1, TBN) int32
    tbn = u_idx.shape[-1]

    # Transposed one-hot gather masks, fully vectorized (no scalar loops):
    # onehot_T[row, j] = (idx[j] == row).  Sublane iota + lane-broadcast compare.
    u_oh = (jax.lax.broadcasted_iota(jnp.int32, (nu, tbn), 0) == u_idx).astype(w_dtype)
    it_oh = (jax.lax.broadcasted_iota(jnp.int32, (ni, tbn), 0) == it_idx).astype(w_dtype)

    # One-hot MXU gather: fuses the row gather with the bf16->f32 upcast and
    # lands the gathered rows already transposed as (E, TBN).  f32 accumulation
    # is forced via preferred_element_type (works on v5e's bf16 MXU too).
    u_rows = jnp.dot(users_wt_ref[...], u_oh, preferred_element_type=jnp.float32)
    it_rows = jnp.dot(items_wt_ref[...], it_oh, preferred_element_type=jnp.float32)

    # Dot product over E = VPU multiply + sublane reduce; keepdims makes the
    # result exactly the (1, TBN) lane-dense output block (no reshape needed).
    o_ref[0] = jnp.sum(u_rows * it_rows, axis=0, keepdims=True)


def _tpu_info():
    """Best-effort (VMEM capacity bytes, TensorCores per chip)."""
    vmem = None
    try:
        vmem = int(pltpu.get_tpu_info().vmem_capacity_bytes)
    except Exception:
        vmem = None
    kind = ""
    try:
        kind = jax.devices()[0].device_kind.lower()
    except Exception:
        pass
    is_v7 = "7" in kind                      # v7x: 2 TCs, 64 MiB VMEM per TC
    if vmem is None:
        vmem = (64 if is_v7 else 128) * 1024 * 1024
    num_cores = 2 if is_v7 else 1
    return vmem, num_cores


def _pick_batch_tile(B, N, E, NU, NI, w_itemsize, *, vmem_budget, num_cores):
    """Largest batch tile (a divisor of B) whose per-step footprint fits the
    per-generation VMEM budget, preferring lane-dense output tiles
    (tb*N % 128 == 0) and, on multi-core chips (v7x), an even number of grid
    steps so the 'parallel' batch axis splits evenly across TensorCores."""
    def footprint(tb):
        tbn = tb * N
        tables = 2 * (NU + NI) * E * w_itemsize   # resident tables (conservatively x2)
        idx = 2 * 2 * tbn * 4                     # two int32 index blocks, double-buffered
        outb = 2 * tbn * 4                        # f32 output block, double-buffered
        onehot = (NU + NI) * tbn * w_itemsize     # one-hot intermediates
        rows = 3 * E * tbn * 4                    # gathered rows + product, f32
        return tables + idx + outb + onehot + rows

    divisors = [tb for tb in range(1, B + 1) if B % tb == 0]
    fitting = [tb for tb in divisors if footprint(tb) <= vmem_budget]
    if not fitting:
        # Nothing fits the estimate: take the smallest tile and let the
        # compiler's vmem limit be the final arbiter (no silent over-commit).
        return 1
    dense = [tb for tb in fitting if (tb * N) % 128 == 0]
    pool = dense or fitting
    if num_cores > 1:
        even = [tb for tb in pool
                if (B // tb) >= num_cores and (B // tb) % num_cores == 0]
        if even:
            return max(even)
    return max(pool)


def latent_factor_forward(users, items, users_weight, items_weight, *,
                          batch_tile=None, interpret=False):
    """users: (B,) int, items: (B, N) int, tables: (rows, E) bf16/f32
       -> (B, N) f32 scores."""
    users = jnp.asarray(users).reshape(-1).astype(jnp.int32)
    items = jnp.asarray(items).astype(jnp.int32)
    B, N = items.shape
    NU, E = users_weight.shape
    NI, E2 = items_weight.shape
    assert E == E2

    vmem_cap, num_cores = _tpu_info()
    # Generation-aware scoped-VMEM limit: ~48 MiB on v7x (64 MiB physical),
    # ~96 MiB on v5e/v6e (128 MiB physical).
    vmem_limit = min(vmem_cap * 3 // 4, 100 * 1024 * 1024)

    if batch_tile is None:
        batch_tile = _pick_batch_tile(
            B, N, E, NU, NI, jnp.dtype(users_weight.dtype).itemsize,
            vmem_budget=int(vmem_limit * 0.6), num_cores=num_cores)
    assert B % batch_tile == 0, "B must be divisible by batch_tile (pad the batch)"
    num_tiles = B // batch_tile
    tbn = batch_tile * N

    # Index plumbing (cheap, XLA-side): repeat each user id N times so both
    # gathers run over the same flat (B*N,) axis, then tile-major reshape.
    # Indices travel as VMEM block inputs (no SMEM next_pow2 padding hazard).
    u_idx = jnp.repeat(users, N).reshape(num_tiles, 1, tbn)
    it_idx = items.reshape(num_tiles, 1, tbn)

    # Tables passed transposed (E, rows); in a real model they would be stored
    # pre-transposed -- here the transpose is a tiny one-off XLA op.
    users_wt = users_weight.T
    items_wt = items_weight.T

    def run(single_buffer_tables):
        tbl_kw = dict(pipeline_mode=pl.Buffered(1)) if single_buffer_tables else {}
        grid_spec = pltpu.PrefetchScalarGridSpec(
            num_scalar_prefetch=0,
            grid=(num_tiles,),
            in_specs=[
                pl.BlockSpec((1, 1, tbn), lambda i: (i, 0, 0)),
                pl.BlockSpec((1, 1, tbn), lambda i: (i, 0, 0)),
                pl.BlockSpec((E, NU), lambda i: (0, 0), **tbl_kw),
                pl.BlockSpec((E, NI), lambda i: (0, 0), **tbl_kw),
            ],
            out_specs=pl.BlockSpec((1, 1, tbn), lambda i: (i, 0, 0)),
        )
        out = pl.pallas_call(
            lfm_kernel,
            out_shape=jax.ShapeDtypeStruct((num_tiles, 1, tbn), jnp.float32),
            grid_spec=grid_spec,
            compiler_params=pltpu.CompilerParams(
                dimension_semantics=("parallel",),
                vmem_limit_bytes=int(vmem_limit)),
            interpret=interpret,
        )(u_idx, it_idx, users_wt, items_wt)
        return jax.block_until_ready(out)

    try:
        out_flat = run(single_buffer_tables=True)
    except Exception:
        # pl.Buffered(1) (single-buffered resident tables) rejected by this
        # jax/backend combination; tables are tiny, fall back to the default
        # double-buffered table blocks.
        out_flat = run(single_buffer_tables=False)
    return out_flat.reshape(B, N)


class LatentFactorModelPallas:
    """Mirrors LatentFactorModel: nn.Embedding-style N(0,1) init.  Tables are
    stored in bfloat16 (halves HBM traffic); all kernel math is float32."""

    def __init__(self, edim, num_users, num_items, key):
        ku, ki = jax.random.split(key)
        self.edim = edim
        self.users_weight = jax.random.normal(
            ku, (num_users, edim), jnp.float32).astype(jnp.bfloat16)
        self.items_weight = jax.random.normal(
            ki, (num_items, edim), jnp.float32).astype(jnp.bfloat16)

    def forward(self, users, items):
        return latent_factor_forward(users, items,
                                     self.users_weight, self.items_weight)


if __name__ == "__main__":
    key = jax.random.PRNGKey(0)
    k_model, k_users, k_items = jax.random.split(key, 3)

    edim = 32
    num_users = 40       # max(user_indexes) + 1
    num_items = 100      # max(node_indexes) + 1
    B = 16               # batch of users
    N = 16               # candidate items per user

    model = LatentFactorModelPallas(edim, num_users, num_items, k_model)

    users = jax.random.randint(k_users, (B,), 0, num_users, dtype=jnp.int32)
    items = jax.random.randint(k_items, (B, N), 0, num_items, dtype=jnp.int32)

    out = model.forward(users, items)
    out = jax.block_until_ready(out)

    # Pure-JAX reference (same bf16-stored weights, f32 math).
    u_ref = model.users_weight[users].astype(jnp.float32)   # (B, E)
    i_ref = model.items_weight[items].astype(jnp.float32)   # (B, N, E)
    ref = jnp.einsum('be,bne->bn', u_ref, i_ref)

    assert out.shape == (B, N)
    assert jnp.allclose(out, ref, atol=1e-3, rtol=1e-3), (
        float(jnp.max(jnp.abs(out - ref))))
    print("KERNEL_OK")
</pallas_src>

<mosaic_0001>
module attributes {stable_mosaic.version = 11 : i64} {
  func.func @lfm_kernel(%arg0: i32, %arg1: memref<1x1x256xi32, #tpu.memory_space<vmem>>, %arg2: memref<1x1x256xi32, #tpu.memory_space<vmem>>, %arg3: memref<32x40xbf16, #tpu.memory_space<vmem>>, %arg4: memref<32x100xbf16, #tpu.memory_space<vmem>>, %arg5: memref<1x1x256xf32, #tpu.memory_space<vmem>>) attributes {dimension_semantics = [#tpu.dimension_semantics<parallel>], iteration_bounds = array<i64: 1>, scalar_prefetch = 0 : i64, scratch_operands = 0 : i64, tpu.core_type = #tpu.core_type<tc>, window_params = [{transform_indices = @transform_0, window_bounds = array<i64: 1, 1, 256>}, {transform_indices = @transform_1, window_bounds = array<i64: 1, 1, 256>}, {pipeline_mode = #tpu.pipeline_mode<synchronous>, transform_indices = @transform_2, window_bounds = array<i64: 32, 40>}, {pipeline_mode = #tpu.pipeline_mode<synchronous>, transform_indices = @transform_3, window_bounds = array<i64: 32, 100>}, {transform_indices = @transform_4, window_bounds = array<i64: 1, 1, 256>}]} {
    %c0 = arith.constant 0 : index
    %c0_0 = arith.constant 0 : index
    %c0_1 = arith.constant 0 : index
    %0 = vector.load %arg1[%c0, %c0_0, %c0_1] : memref<1x1x256xi32, #tpu.memory_space<vmem>>, vector<1x1x256xi32>
    %1 = vector.shape_cast %0 : vector<1x1x256xi32> to vector<1x256xi32>
    %c0_2 = arith.constant 0 : index
    %c0_3 = arith.constant 0 : index
    %c0_4 = arith.constant 0 : index
    %2 = vector.load %arg2[%c0_2, %c0_3, %c0_4] : memref<1x1x256xi32, #tpu.memory_space<vmem>>, vector<1x1x256xi32>
    %3 = vector.shape_cast %2 : vector<1x1x256xi32> to vector<1x256xi32>
    %4 = tpu.iota {dimensions = array<i32: 0>} : vector<40x256xi32>
    %5 = vector.broadcast %1 : vector<1x256xi32> to vector<40x256xi32>
    %6 = arith.cmpi eq, %4, %5 : vector<40x256xi32>
    %7 = arith.extui %6 : vector<40x256xi1> to vector<40x256xi32>
    %8 = arith.sitofp %7 : vector<40x256xi32> to vector<40x256xf32>
    %9 = arith.truncf %8 : vector<40x256xf32> to vector<40x256xbf16>
    %10 = tpu.iota {dimensions = array<i32: 0>} : vector<100x256xi32>
    %11 = vector.broadcast %3 : vector<1x256xi32> to vector<100x256xi32>
    %12 = arith.cmpi eq, %10, %11 : vector<100x256xi32>
    %13 = arith.extui %12 : vector<100x256xi1> to vector<100x256xi32>
    %14 = arith.sitofp %13 : vector<100x256xi32> to vector<100x256xf32>
    %15 = arith.truncf %14 : vector<100x256xf32> to vector<100x256xbf16>
    %c0_5 = arith.constant 0 : index
    %c0_6 = arith.constant 0 : index
    %16 = vector.load %arg3[%c0_5, %c0_6] : memref<32x40xbf16, #tpu.memory_space<vmem>>, vector<32x40xbf16>
    %cst = arith.constant dense<0.000000e+00> : vector<32x256xf32>
    %17 = tpu.matmul %16, %9, %cst {dimension_numbers = #tpu.dot_dimension_numbers<[1], [0], [0], [1], [0, 0, 1, 1], [], []>} : vector<32x40xbf16>, vector<40x256xbf16>, vector<32x256xf32> -> vector<32x256xf32>
    %c0_7 = arith.constant 0 : index
    %c0_8 = arith.constant 0 : index
    %18 = vector.load %arg4[%c0_7, %c0_8] : memref<32x100xbf16, #tpu.memory_space<vmem>>, vector<32x100xbf16>
    %cst_9 = arith.constant dense<0.000000e+00> : vector<32x256xf32>
    %19 = tpu.matmul %18, %15, %cst_9 {dimension_numbers = #tpu.dot_dimension_numbers<[1], [0], [0], [1], [0, 0, 1, 1], [], []>} : vector<32x100xbf16>, vector<100x256xbf16>, vector<32x256xf32> -> vector<32x256xf32>
    %20 = arith.mulf %17, %19 : vector<32x256xf32>
    %cst_10 = arith.constant dense<0.000000e+00> : vector<256xf32>
    %21 = vector.multi_reduction <add>, %20, %cst_10 [0] : vector<32x256xf32> to vector<256xf32>
    %22 = vector.shape_cast %21 : vector<256xf32> to vector<1x256xf32>
    %c0_11 = arith.constant 0 : index
    %c0_12 = arith.constant 0 : index
    %c0_13 = arith.constant 0 : index
    %23 = vector.load %arg5[%c0_11, %c0_12, %c0_13] : memref<1x1x256xf32, #tpu.memory_space<vmem>>, vector<1x1x256xf32>
    %24 = vector.shape_cast %23 : vector<1x1x256xf32> to vector<1x256xf32>
    %25 = vector.shape_cast %22 : vector<1x256xf32> to vector<1x1x256xf32>
    tpu.vector_store %arg5[%c0_11, %c0_12, %c0_13], %25 {strides = array<i32>} : memref<1x1x256xf32, #tpu.memory_space<vmem>>, vector<1x1x256xf32>,
    return
  }
  func.func @transform_0(%arg0: i32) -> (i32, i32, i32) {
    %c0_i32 = arith.constant 0 : i32
    %c0_i32_0 = arith.constant 0 : i32
    %c0_i32_1 = arith.constant 0 : i32
    return %arg0, %c0_i32, %c0_i32_0 : i32, i32, i32
  }
  func.func @transform_1(%arg0: i32) -> (i32, i32, i32) {
    %c0_i32 = arith.constant 0 : i32
    %c0_i32_0 = arith.constant 0 : i32
    %c0_i32_1 = arith.constant 0 : i32
    return %arg0, %c0_i32, %c0_i32_0 : i32, i32, i32
  }
  func.func @transform_2(%arg0: i32) -> (i32, i32) {
    %c0_i32 = arith.constant 0 : i32
    %c0_i32_0 = arith.constant 0 : i32
    %c0_i32_1 = arith.constant 0 : i32
    return %c0_i32, %c0_i32_0 : i32, i32
  }
  func.func @transform_3(%arg0: i32) -> (i32, i32) {
    %c0_i32 = arith.constant 0 : i32
    %c0_i32_0 = arith.constant 0 : i32
    %c0_i32_1 = arith.constant 0 : i32
    return %c0_i32, %c0_i32_0 : i32, i32
  }
  func.func @transform_4(%arg0: i32) -> (i32, i32, i32) {
    %c0_i32 = arith.constant 0 : i32
    %c0_i32_0 = arith.constant 0 : i32
    %c0_i32_1 = arith.constant 0 : i32
    return %arg0, %c0_i32, %c0_i32_0 : i32, i32, i32
  }
}

module attributes {stable_mosaic.version = 11 : i64} {
  func.func @lfm_kernel(%arg0: i32, %arg1: memref<1x1x256xi32, #tpu.memory_space<vmem>>, %arg2: memref<1x1x256xi32, #tpu.memory_space<vmem>>, %arg3: memref<32x40xbf16, #tpu.memory_space<vmem>>, %arg4: memref<32x100xbf16, #tpu.memory_space<vmem>>, %arg5: memref<1x1x256xf32, #tpu.memory_space<vmem>>) attributes {dimension_semantics = [#tpu.dimension_semantics<parallel>], iteration_bounds = array<i64: 1>, scalar_prefetch = 0 : i64, scratch_operands = 0 : i64, tpu.core_type = #tpu.core_type<tc>, window_params = [{transform_indices = @transform_0, window_bounds = array<i64: 1, 1, 256>}, {transform_indices = @transform_1, window_bounds = array<i64: 1, 1, 256>}, {pipeline_mode = #tpu.pipeline_mode<synchronous>, transform_indices = @transform_2, window_bounds = array<i64: 32, 40>}, {pipeline_mode = #tpu.pipeline_mode<synchronous>, transform_indices = @transform_3, window_bounds = array<i64: 32, 100>}, {transform_indices = @transform_4, window_bounds = array<i64: 1, 1, 256>}]} {
    %c0 = arith.constant 0 : index
    %c0_0 = arith.constant 0 : index
    %c0_1 = arith.constant 0 : index
    %0 = vector.load %arg1[%c0, %c0_0, %c0_1] : memref<1x1x256xi32, #tpu.memory_space<vmem>>, vector<1x1x256xi32>
    %1 = vector.shape_cast %0 : vector<1x1x256xi32> to vector<1x256xi32>
    %c0_2 = arith.constant 0 : index
    %c0_3 = arith.constant 0 : index
    %c0_4 = arith.constant 0 : index
    %2 = vector.load %arg2[%c0_2, %c0_3, %c0_4] : memref<1x1x256xi32, #tpu.memory_space<vmem>>, vector<1x1x256xi32>
    %3 = vector.shape_cast %2 : vector<1x1x256xi32> to vector<1x256xi32>
    %4 = tpu.iota {dimensions = array<i32: 0>} : vector<40x256xi32>
    %5 = vector.broadcast %1 : vector<1x256xi32> to vector<40x256xi32>
    %6 = arith.cmpi eq, %4, %5 : vector<40x256xi32>
    %7 = arith.extui %6 : vector<40x256xi1> to vector<40x256xi32>
    %8 = arith.sitofp %7 : vector<40x256xi32> to vector<40x256xf32>
    %9 = arith.truncf %8 : vector<40x256xf32> to vector<40x256xbf16>
    %10 = tpu.iota {dimensions = array<i32: 0>} : vector<100x256xi32>
    %11 = vector.broadcast %3 : vector<1x256xi32> to vector<100x256xi32>
    %12 = arith.cmpi eq, %10, %11 : vector<100x256xi32>
    %13 = arith.extui %12 : vector<100x256xi1> to vector<100x256xi32>
    %14 = arith.sitofp %13 : vector<100x256xi32> to vector<100x256xf32>
    %15 = arith.truncf %14 : vector<100x256xf32> to vector<100x256xbf16>
    %c0_5 = arith.constant 0 : index
    %c0_6 = arith.constant 0 : index
    %16 = vector.load %arg3[%c0_5, %c0_6] : memref<32x40xbf16, #tpu.memory_space<vmem>>, vector<32x40xbf16>
    %cst = arith.constant dense<0.000000e+00> : vector<32x256xf32>
    %17 = tpu.matmul %16, %9, %cst {dimension_numbers = #tpu.dot_dimension_numbers<[1], [0], [0], [1], [0, 0, 1, 1], [], []>} : vector<32x40xbf16>, vector<40x256xbf16>, vector<32x256xf32> -> vector<32x256xf32>
    %c0_7 = arith.constant 0 : index
    %c0_8 = arith.constant 0 : index
    %18 = vector.load %arg4[%c0_7, %c0_8] : memref<32x100xbf16, #tpu.memory_space<vmem>>, vector<32x100xbf16>
    %cst_9 = arith.constant dense<0.000000e+00> : vector<32x256xf32>
    %19 = tpu.matmul %18, %15, %cst_9 {dimension_numbers = #tpu.dot_dimension_numbers<[1], [0], [0], [1], [0, 0, 1, 1], [], []>} : vector<32x100xbf16>, vector<100x256xbf16>, vector<32x256xf32> -> vector<32x256xf32>
    %20 = arith.mulf %17, %19 : vector<32x256xf32>
    %cst_10 = arith.constant dense<0.000000e+00> : vector<256xf32>
    %21 = vector.multi_reduction <add>, %20, %cst_10 [0] : vector<32x256xf32> to vector<256xf32>
    %22 = vector.shape_cast %21 : vector<256xf32> to vector<1x256xf32>
    %c0_11 = arith.constant 0 : index
    %c0_12 = arith.constant 0 : index
    %c0_13 = arith.constant 0 : index
    %23 = vector.load %arg5[%c0_11, %c0_12, %c0_13] : memref<1x1x256xf32, #tpu.memory_space<vmem>>, vector<1x1x256xf32>
    %24 = vector.shape_cast %23 : vector<1x1x256xf32> to vector<1x256xf32>
    %25 = vector.shape_cast %22 : vector<1x256xf32> to vector<1x1x256xf32>
    tpu.vector_store %arg5[%c0_11, %c0_12, %c0_13], %25 {strides = array<i32>} : memref<1x1x256xf32, #tpu.memory_space<vmem>>, vector<1x1x256xf32>,
    return
  }
  func.func @transform_0(%arg0: i32) -> (i32, i32, i32) {
    %c0_i32 = arith.constant 0 : i32
    %c0_i32_0 = arith.constant 0 : i32
    %c0_i32_1 = arith.constant 0 : i32
    return %arg0, %c0_i32, %c0_i32_0 : i32, i32, i32
  }
  func.func @transform_1(%arg0: i32) -> (i32, i32, i32) {
    %c0_i32 = arith.constant 0 : i32
    %c0_i32_0 = arith.constant 0 : i32
    %c0_i32_1 = arith.constant 0 : i32
    return %arg0, %c0_i32, %c0_i32_0 : i32, i32, i32
  }
  func.func @transform_2(%arg0: i32) -> (i32, i32) {
    %c0_i32 = arith.constant 0 : i32
    %c0_i32_0 = arith.constant 0 : i32
    %c0_i32_1 = arith.constant 0 : i32
    return %c0_i32, %c0_i32_0 : i32, i32
  }
  func.func @transform_3(%arg0: i32) -> (i32, i32) {
    %c0_i32 = arith.constant 0 : i32
    %c0_i32_0 = arith.constant 0 : i32
    %c0_i32_1 = arith.constant 0 : i32
    return %c0_i32, %c0_i32_0 : i32, i32
  }
  func.func @transform_4(%arg0: i32) -> (i32, i32, i32) {
    %c0_i32 = arith.constant 0 : i32
    %c0_i32_0 = arith.constant 0 : i32
    %c0_i32_1 = arith.constant 0 : i32
    return %arg0, %c0_i32, %c0_i32_0 : i32, i32, i32
  }
}

</mosaic_0001>

<bundles_post_ra>
// kernel: tpu_custom_call.1
= control target key start
LH: loop header
LB: loop body
LE: loop exit
PB: predicated region body
PF: predicated region fallthrough
CT: control target
= control target key end

     0   :  { %9 = vsyncpa [#allocation3], 0  ;;  %s883_s0 = inlined_call_operand.hbm [shape: s32[1,1,256], index: 0, kind: input, shape index: {}]   ;;  %s884_s1 = inlined_call_operand.hbm [shape: s32[1,1,256], index: 1, kind: input, shape index: {}]   ;;  %s885_s2 = inlined_call_operand.hbm [shape: bf16[32,40], index: 2, kind: input, shape index: {}]   ;;  %s886_s3 = inlined_call_operand.hbm [shape: bf16[32,100], index: 3, kind: input, shape index: {}]   ;;  %s887_s4 = inlined_call_operand.hbm [shape: f32[1,1,256], index: 4, kind: output, shape index: {}]  }
   0x1   :  { %10 = vsyncpa [#allocation6], 0 }
   0x2   :  { %11 = vsyncpa [#allocation9], 0 }
   0x3   :  { %12 = vsyncpa [#allocation4], 0  ;;  %s669_s15 = smov [#allocation5]   ;;  %s670_s17 = smov [#allocation2]  }
   0x4   :  { %s29_s16 = sshll.u32 %s669_s15, 4  ;;  %s19_s18 = sshll.u32 %s670_s17, 4  ;;  %s30_s16 = int_to_ptr.vmem [resolvable:$true] %s29_s16  ;;  %s20_s18 = int_to_ptr.vmem [resolvable:$true] %s19_s18 }
   0x5   :  { %s551_s21 = scalar_lea.hbm %s884_s1, 32 }
   0x6   :  { %p552_p0 = scmp.ne.s32.totalorder %s884_s1, %s551_s21  ;;  %p555_p1 = scmp.lt.u32.totalorder %s551_s21, %s884_s1 }
   0x8   :  { %p557_p2 = pnand %p555_p1, %p552_p0 }
   0xa   :  { %560 = shalt.err (!%p557_p2)
}
   0xb   :  { %s561_s26 = scalar_lea.vmem %s30_s16, 32  ;;  %p566_p4 = scmp.lt.s32.totalorder %s30_s16, %s30_s16 }
   0xc   :  { %p562_p3 = scmp.ne.s32.totalorder %s30_s16, %s561_s26  ;;  %p567_p5 = scmp.lt.s32.totalorder %s561_s26, %s561_s26 }
   0xe   :  { %p568_p6 = por %p567_p5, %p566_p4 }
  0x10   :  { %p569_p7 = pnand %p568_p6, %p562_p3 }
  0x12   :  { %572 = shalt.err (!%p569_p7)
}
  0x13   :  { %32 = dma.hbm_to_vmem [thread:$0]  %s884_s1, 32, %s30_s16, [#allocation6]  }
  0x14   :  { %s573_s5 = scalar_lea.hbm %s883_s0, 32 }
  0x15   :  { %p574_p8 = scmp.ne.s32.totalorder %s883_s0, %s573_s5  ;;  %p577_p9 = scmp.lt.u32.totalorder %s573_s5, %s883_s0 }
  0x17   :  { %p579_p10 = pnand %p577_p9, %p574_p8 }
  0x19   :  { %582 = shalt.err (!%p579_p10)
}
  0x1a   :  { %s583_s10 = scalar_lea.vmem %s20_s18, 32  ;;  %p588_p12 = scmp.lt.s32.totalorder %s20_s18, %s20_s18 }
  0x1b   :  { %p584_p11 = scmp.ne.s32.totalorder %s20_s18, %s583_s10  ;;  %p589_p13 = scmp.lt.s32.totalorder %s583_s10, %s583_s10 }
  0x1d   :  { %p590_p0 = por %p589_p13, %p588_p12 }
  0x1f   :  { %p591_p1 = pnand %p590_p0, %p584_p11 }
  0x21   :  { %594 = shalt.err (!%p591_p1)
}
  0x22   :  { %22 = dma.hbm_to_vmem [thread:$0]  %s883_s0, 32, %s20_s18, [#allocation3]  }
  0x23   :  { %s671_s12 = smov [#allocation7]   ;;  %s595_s16 = scalar_lea.hbm %s885_s2, 256 }
  0x24   :  { %s38_s13 = sshll.u32 %s671_s12, 4  ;;  %p596_p2 = scmp.ne.s32.totalorder %s885_s2, %s595_s16  ;;  %s39_s13 = int_to_ptr.vmem [resolvable:$true] %s38_s13 }
  0x25   :  { %p599_p3 = scmp.lt.u32.totalorder %s595_s16, %s885_s2 }
  0x27   :  { %p601_p4 = pnand %p599_p3, %p596_p2 }
  0x29   :  { %604 = shalt.err (!%p601_p4)
}
  0x2a   :  { %s605_s22 = scalar_lea.vmem %s39_s13, 256  ;;  %p610_p6 = scmp.lt.s32.totalorder %s39_s13, %s39_s13 }
  0x2b   :  { %p606_p5 = scmp.ne.s32.totalorder %s39_s13, %s605_s22  ;;  %p611_p7 = scmp.lt.s32.totalorder %s605_s22, %s605_s22 }
  0x2d   :  { %p612_p8 = por %p611_p7, %p610_p6 }
  0x2f   :  { %p613_p9 = pnand %p612_p8, %p606_p5 }
  0x31   :  { %616 = shalt.err (!%p613_p9)
}
  0x32   :  { %s672_s0 = smov 64   ;;  %s673_s18 = smov 4  }
  0x33   :  { %44 = dma.hbm_to_vmem [thread:$0]  %s885_s2, 256, %s39_s13, [#allocation6], %s672_s0, %s672_s0, %s673_s18  }
  0x34   :  { %s674_s25 = smov [#allocation8]   ;;  %s617_s29 = scalar_lea.hbm %s886_s3, 256 }
  0x35   :  { %s50_s26 = sshll.u32 %s674_s25, 4  ;;  %p618_p10 = scmp.ne.s32.totalorder %s886_s3, %s617_s29  ;;  %s51_s26 = int_to_ptr.vmem [resolvable:$true] %s50_s26 }
  0x36   :  { %p621_p11 = scmp.lt.u32.totalorder %s617_s29, %s886_s3 }
  0x38   :  { %p623_p12 = pnand %p621_p11, %p618_p10 }
  0x3a   :  { %626 = shalt.err (!%p623_p12)
}
  0x3b   :  { %s627_s8 = scalar_lea.vmem %s51_s26, 256  ;;  %p632_p0 = scmp.lt.s32.totalorder %s51_s26, %s51_s26 }
  0x3c   :  { %p628_p13 = scmp.ne.s32.totalorder %s51_s26, %s627_s8  ;;  %p633_p1 = scmp.lt.s32.totalorder %s627_s8, %s627_s8 }
  0x3e   :  { %p634_p2 = por %p633_p1, %p632_p0 }
  0x40   :  { %p635_p3 = pnand %p634_p2, %p628_p13 }
  0x42   :  { %638 = shalt.err (!%p635_p3)
}
  0x43   :  { %56 = dma.hbm_to_vmem [thread:$0]  %s886_s3, 256, %s51_s26, [#allocation9], %s672_s0, %s672_s0, %s673_s18  }
  0x44   :  { %661 = dma.done.wait [#allocation3], 32  }
  0x45   :  { %662 = vsyncadd [#allocation3], 4294967264 }
  0x46   :  { %663 = dma.done.wait [#allocation6], 288  }
  0x47   :  { %664 = vsyncadd [#allocation6], 4294967008 }
  0x48   :  { %665 = dma.done.wait [#allocation9], 256  }
  0x49   :  { %666 = vsyncadd [#allocation9], 4294967040  ;;  %v72_v0 = vlaneseq  ;;  %v675_v2 = vmov 0   ;;  %v71_v6 = vld [vmem:[#allocation5] sm:$0x3]  ;;  %v677_v24 = vmov 0.0  }
  0x4a   :  { %290 = vmatprep.mubr.bf16.mxu0 %v675_v2  ;;  %371 = vmatprep.mubr.bf16.mxu1 %v675_v2  ;;  %v70_v9 = vld [vmem:[#allocation2] sm:$0x3]  ;;  %v676_v15 = vmov 1.0|1.0   ;;  %v892_v29 = vmov 0  ;;  %v547_v35 = vld [vmem:[#allocation7] sm:$0xff]  }
  0x4b   :  { %v754_v1 = vshrl.u32 %v72_v0, 7  ;;  %v548_v39 = vld [vmem:[#allocation8] sm:$0xff]   ;;  %v549_v40 = vld [vmem:[#allocation7 + $0x8] sm:$0xff]   ;;  %v550_v41 = vld [vmem:[#allocation8 + $0x8] sm:$0xff]   ;;  %s679_s3 = smov [#allocation10]  }
  0x4c   :  { %s447_s10 = sshll.u32 %s679_s3, 4  ;;  %s448_s10 = int_to_ptr.vmem [resolvable:$true] %s447_s10 }
  0x4d   :  { %v84_v3 = vsub.s32 1, %v754_v1  ;;  %v80_v4 = vsub.s32 0, %v754_v1  ;;  %v74_v5 = vadd.s32 8, %v754_v1  ;;  %v762_v7 = vadd.s32 16, %v754_v1  ;;  %s639_s1 = scalar_lea.vmem %s448_s10, 32  ;;  %p644_p5 = scmp.lt.s32.totalorder %s448_s10, %s448_s10 }
  0x4e   :  { %v765_v8 = vadd.s32 24, %v754_v1  ;;  %v77_v12 = vadd.s32 32, %v754_v1  ;;  %v122_v13 = vadd.s32 40, %v754_v1  ;;  %v123_v16 = vadd.s32 48, %v754_v1  ;;  %p640_p4 = scmp.ne.s32.totalorder %s448_s10, %s639_s1  ;;  %p645_p6 = scmp.lt.s32.totalorder %s639_s1, %s639_s1 }
  0x4f   :  { %v767_v10 = vrot.slane %v71_v6, %v84_v3  ;;  %v769_v11 = vrot.slane %v71_v6, %v80_v4  ;;  %v85_v14 = vrot.slane %v70_v9, %v84_v3  ;;  %v124_v17 = vadd.s32 56, %v754_v1 }
  0x50   :  { %v81_v18 = vrot.slane %v70_v9, %v80_v4  ;;  %v125_v19 = vadd.s32 64, %v754_v1  ;;  %v126_v20 = vadd.s32 72, %v754_v1  ;;  %v127_v22 = vadd.s32 80, %v754_v1  ;;  %p646_p7 = por %p645_p6, %p644_p5 }
  0x51   :  { %vm139_vm0 = vcmp.eq.s32.totalorder %v754_v1, %v767_v10  ;;  %vm141_vm1 = vcmp.eq.s32.totalorder %v74_v5, %v767_v10  ;;  %vm138_vm2 = vcmp.eq.s32.totalorder %v754_v1, %v769_v11  ;;  %vm140_vm3 = vcmp.eq.s32.totalorder %v74_v5, %v769_v11 }
  0x52   :  { %vm509_vm4 = vmpackc.low %vm141_vm1, %vm139_vm0  ;;  %vm143_vm5 = vcmp.eq.s32.totalorder %v762_v7, %v767_v10  ;;  %vm145_vm6 = vcmp.eq.s32.totalorder %v765_v8, %v767_v10  ;;  %vm142_vm7 = vcmp.eq.s32.totalorder %v762_v7, %v769_v11  ;;  %vm144_vm8 = vcmp.eq.s32.totalorder %v765_v8, %v769_v11  ;;  %p647_p8 = pnand %p646_p7, %p640_p4 }
  0x53   :  { %510 = vmatprep.subr.msk.bf16.mxu1 %vm509_vm4, %v676_v15  ;;  %vm511_vm9 = vmpackc.low %vm140_vm3, %vm138_vm2  ;;  %vm147_vm10 = vcmp.eq.s32.totalorder %v77_v12, %v767_v10  ;;  %vm149_vm11 = vcmp.eq.s32.totalorder %v122_v13, %v767_v10  ;;  %vm146_vm14 = vcmp.eq.s32.totalorder %v77_v12, %v769_v11  ;;  %vm148_vm15 = vcmp.eq.s32.totalorder %v122_v13, %v769_v11 }
  0x54   :  { %512 = vmatpush1.bf16.msk.msra.mxu1 %vm511_vm9, %v676_v15  ;;  %vm513_vm12 = vmpackc.low %vm145_vm6, %vm143_vm5  ;;  %vm87_vm1 = vcmp.eq.s32.totalorder %v754_v1, %v85_v14  ;;  %vm89_vm2 = vcmp.eq.s32.totalorder %v74_v5, %v85_v14  ;;  %vm151_vm3 = vcmp.eq.s32.totalorder %v123_v16, %v767_v10  ;;  %vm153_vm4 = vcmp.eq.s32.totalorder %v124_v17, %v767_v10 }
  0x55   :  { %514 = vmatprep.subr.msk.bf16.mxu1 %vm513_vm12, %v676_v15  ;;  %vm515_vm13 = vmpackc.low %vm144_vm8, %vm142_vm7  ;;  %vm86_vm6 = vcmp.eq.s32.totalorder %v754_v1, %v81_v18  ;;  %vm88_vm7 = vcmp.eq.s32.totalorder %v74_v5, %v81_v18  ;;  %vm95_vm8 = vcmp.eq.s32.totalorder %v77_v12, %v85_v14  ;;  %vm94_vm12 = vcmp.eq.s32.totalorder %v77_v12, %v81_v18 }
  0x56   :  { %vm517_vm0 = vmpackc.low %vm149_vm11, %vm147_vm10  ;;  %vm150_vm10 = vcmp.eq.s32.totalorder %v123_v16, %v769_v11  ;;  %vm152_vm11 = vcmp.eq.s32.totalorder %v124_v17, %v769_v11  ;;  %v467_v25 = vsel %vm95_vm8, 1.0, %v677_v24  ;;  %v466_v26 = vsel %vm94_vm12, 1.0, %v677_v24 }
  0x57   :  { %vm802_vm5 = vmpackc.low %vm148_vm15, %vm146_vm14  ;;  %vm91_vm14 = vcmp.eq.s32.totalorder %v762_v7, %v85_v14  ;;  %vm93_vm15 = vcmp.eq.s32.totalorder %v765_v8, %v85_v14  ;;  %v128_v27 = vadd.s32 88, %v754_v1  ;;  %v129_v28 = vadd.s32 96, %v754_v1 }
  0x58   :  { %516 = vmatpush1.bf16.msk.msra.mxu1 %vm515_vm13, %v676_v15  ;;  %vm496_vm9 = vmpackc.low %vm89_vm2, %vm87_vm1  ;;  %vm155_vm1 = vcmp.eq.s32.totalorder %v125_v19, %v767_v10  ;;  %vm157_vm2 = vcmp.eq.s32.totalorder %v126_v20, %v767_v10  ;;  %v121_v30 = vpack.c.bf16 %v467_v25, %v467_v25  ;;  %v120_v31 = vpack.c.bf16 %v466_v26, %v466_v26 }
  0x59   :  { %518 = vmatprep.subr.msk.bf16.mxu1 %vm517_vm0, %v676_v15  ;;  %vm813_vm13 = vmpackc.low %vm153_vm4, %vm151_vm3  ;;  %497 = vmatprep.subr.msk.bf16.mxu0 %vm496_vm9, %v676_v15  ;;  %vm90_vm4 = vcmp.eq.s32.totalorder %v762_v7, %v81_v18  ;;  %vm154_vm8 = vcmp.eq.s32.totalorder %v125_v19, %v769_v11  ;;  %vm156_vm9 = vcmp.eq.s32.totalorder %v126_v20, %v769_v11  ;;  %v678_v14 = vmov 1966171168  }
  0x5a   :  { %vm498_vm0 = vmpackc.low %vm88_vm7, %vm86_vm6  ;;  %vm92_vm6 = vcmp.eq.s32.totalorder %v765_v8, %v81_v18  ;;  %vm159_vm12 = vcmp.eq.s32.totalorder %v127_v22, %v767_v10 }
  0x5b   :  { %vm834_vm3 = vmpackc.low %vm152_vm11, %vm150_vm10  ;;  %499 = vmatpush1.bf16.msk.msra.mxu0 %vm498_vm0, %v676_v15  ;;  %vm251_vm10 = vcmask 1043456   ;;  %vm163_vm0 = vcmp.eq.s32.totalorder %v129_v28, %v767_v10 }
  0x5c   :  { %520 = vmatpush1.bf16.msk.msra.mxu1 %vm802_vm5, %v676_v15  ;;  %v893_v29 = vsel %vm834_vm3, 4294967295, %v892_v29  ;;  %vm500_vm5 = vmpackc.low %vm93_vm15, %vm91_vm14  ;;  %vm162_vm3 = vcmp.eq.s32.totalorder %v129_v28, %v769_v11  ;;  %v253_v32 = vsel %vm251_vm10, %v120_v31, 0  ;;  %v493_v33 = vsel %vm163_vm0, 1.0, %v677_v24 }
  0x5d   :  { %522 = vmatprep.subr.msk.bf16.mxu1 %vm813_vm13, %v676_v15  ;;  %vm525_vm7 = vmpackc.low %vm157_vm2, %vm155_vm1  ;;  %501 = vmatprep.subr.msk.bf16.mxu0 %vm500_vm5, %v676_v15  ;;  %vm161_vm13 = vcmp.eq.s32.totalorder %v128_v27, %v767_v10  ;;  %vm894_vm14 = vnez %v893_v29  ;;  %vm158_vm2 = vcmp.eq.s32.totalorder %v127_v22, %v769_v11  ;;  %v492_v34 = vsel %vm162_vm3, 1.0, %v677_v24 }
  0x5e   :  { %vm502_vm11 = vmpackc.low %vm92_vm6, %vm90_vm4  ;;  %vm160_vm4 = vcmp.eq.s32.totalorder %v128_v27, %v769_v11  ;;  %vm244_vm6 = vcmask 326656   ;;  %v229_v36 = vpack.c.bf16 %v493_v33, %v493_v33  ;;  %v228_v37 = vpack.c.bf16 %v492_v34, %v492_v34 }
  0x5f   :  { %503 = vmatpush1.bf16.msk.msra.mxu0 %vm502_vm11, %v676_v15  ;;  %vm527_vm15 = vmpackc.low %vm156_vm9, %vm154_vm8  ;;  %vm325_vm3 = vcmask 818176   ;;  %vm438_vm8 = vcmp.lt.s32.totalorder %v72_v0, 256 }
  0x60   :  { %524 = vmatpush1.bf16.msk.msra.mxu1 %vm894_vm14, %v676_v15  ;;  %504 = vmatprep.subr.msk.bf16.mxu0 %vm251_vm10, %v121_v30  ;;  %vm529_vm1 = vmpackc.low %vm161_vm13, %vm159_vm12 }
  0x61   :  { %526 = vmatprep.subr.msk.bf16.mxu1 %vm525_vm7, %v676_v15  ;;  %vm531_vm5 = vmpackc.low %vm160_vm4, %vm158_vm2  ;;  %vm332_vm7 = vcmask 1041408  }
  0x62   :  { %v334_v38 = vsel %vm332_vm7, %v228_v37, 0 }
  0x63   :  { %263 = vmatpush1.bf16.msra.mxu0 %v253_v32 }
  0x64   :  { %528 = vmatpush1.bf16.msk.msra.mxu1 %vm527_vm15, %v676_v15 }
  0x65   :  { %530 = vmatprep.subr.msk.bf16.mxu1 %vm529_vm1, %v676_v15 }
  0x66   :  { %505 = vmatmul.mubr.msk.bf16.vlgmr.msra.gmra.mrb[0].mxu0 %vm244_vm6, %v547_v35 }
  0x67   :  { %300 = vmatprep.mubr.bf16.mxu0 %v675_v2 }
  0x68   :  { %532 = vmatpush1.bf16.msk.msra.mxu1 %vm531_vm5, %v676_v15  ;;  %v422_v15 = vunpack.c.l.s4 %v678_v14 }
  0x69   :  { %533 = vmatprep.subr.msk.bf16.mxu1 %vm332_vm7, %v229_v36 }
  0x6a   :  { %v423_v20 = vunpack.c.0.s8 %v422_v15 }
  0x6c   :  { %352 = vmatpush1.bf16.msra.mxu1 %v334_v38  ;;  %v426_v25 = vsub.s32 %v423_v20, %v754_v1 }
  0x6e   :  { %506 = vmatmul.mubr.msk.bf16.gmra.mrb[4].mxu0 %vm244_vm6, %v549_v40 }
  0x6f   :  { %534 = vmatmul.mubr.msk.bf16.vlgmr.msra.gmra.mrb[0].mxu1 %vm325_vm3, %v548_v39 }
  0x70   :  { %381 = vmatprep.mubr.bf16.mxu1 %v675_v2 }
  0x77   :  { %535 = vmatmul.mubr.msk.bf16.gmra.mrb[4].mxu1 %vm325_vm3, %v550_v41 }
 0x139   :  { %v292_v42 = vpop.f32.mrb[0].mxu0 }
 0x13a   :  { %v294_v43 = vpop.f32.mrb[1].mxu0 }
 0x13b   :  { %v296_v44 = vpop.f32.mrb[2].mxu0 }
 0x13c   :  { %v298_v45 = vpop.f32.mrb[3].mxu0 }
 0x141   :  { %v302_v47 = vpop.f32.mrb[4].mxu0 }
 0x142   :  { %v373_v46 = vpop.f32.mrb[0].mxu1  ;;  %v304_v50 = vpop.f32.mrb[5].mxu0 }
 0x143   :  { %v392_v48 = vmul.f32 %v373_v46, %v292_v42  ;;  %v375_v49 = vpop.f32.mrb[1].mxu1  ;;  %v306_v53 = vpop.f32.mrb[6].mxu0 }
 0x144   :  { %v393_v51 = vmul.f32 %v375_v49, %v294_v43  ;;  %v377_v52 = vpop.f32.mrb[2].mxu1  ;;  %v308_v56 = vpop.f32.mrb[7].mxu0 }
 0x145   :  { %v394_v54 = vmul.f32 %v377_v52, %v296_v44  ;;  %v379_v55 = vpop.f32.mrb[3].mxu1 }
 0x146   :  { %v395_v57 = vmul.f32 %v379_v55, %v298_v45 }
 0x147   :  { %v400_v58 = vadd.f32 %v394_v54, %v392_v48 }
 0x148   :  { %v409_v59 = vadd.f32 %v395_v57, %v393_v51 }
 0x14a   :  { %v383_v60 = vpop.f32.mrb[4].mxu1 }
 0x14b   :  { %v396_v61 = vmul.f32 %v383_v60, %v302_v47  ;;  %v385_v62 = vpop.f32.mrb[5].mxu1 }
 0x14c   :  { %v397_v63 = vmul.f32 %v385_v62, %v304_v50  ;;  %v387_v2 = vpop.f32.mrb[6].mxu1 }
 0x14d   :  { %v401_v3 = vadd.f32 %v400_v58, %v396_v61  ;;  %v398_v4 = vmul.f32 %v387_v2, %v306_v53  ;;  %v389_v5 = vpop.f32.mrb[7].mxu1 }
 0x14e   :  { %v410_v6 = vadd.f32 %v409_v59, %v397_v63  ;;  %v399_v7 = vmul.f32 %v389_v5, %v308_v56 }
 0x14f   :  { %v402_v8 = vadd.f32 %v401_v3, %v398_v4 }
 0x150   :  { %v411_v9 = vadd.f32 %v410_v6, %v399_v7 }
 0x151   :  { %v403_v10 = vrot.slane %v402_v8, 4 }
 0x152   :  { %v412_v11 = vrot.slane %v411_v9, 4 }
 0x153   :  { %v404_v12 = vadd.f32 %v403_v10, %v402_v8 }
 0x154   :  { %v413_v13 = vadd.f32 %v412_v11, %v411_v9 }
 0x155   :  { %v405_v16 = vrot.slane %v404_v12, 2 }
 0x156   :  { %v414_v17 = vrot.slane %v413_v13, 2 }
 0x157   :  { %v406_v18 = vadd.f32 %v405_v16, %v404_v12 }
 0x158   :  { %v415_v19 = vadd.f32 %v414_v17, %v413_v13 }
 0x159   :  { %v407_v21 = vrot.slane %v406_v18, 1 }
 0x15a   :  { %v416_v22 = vrot.slane %v415_v19, 1 }
 0x15b   :  { %v408_v23 = vadd.f32 %v407_v21, %v406_v18 }
 0x15c   :  { %v417_v24 = vadd.f32 %v416_v22, %v415_v19 }
 0x15e   :  { %v420_v26 = vcombine.low %v408_v23, %v417_v24 }
 0x160   :  { %v427_v27 = vrot.slane %v420_v26, %v426_v25 }
 0x162   :  { %v434_v28 = vrot.slane %v427_v27, %v426_v25 }
 0x164   :  { %440 = vst.msk [vmem:[#allocation10] sm:$0x3] %vm438_vm8, %v434_v28 }
 0x165   :  { %650 = shalt.err (!%p647_p8)
}
 0x166   :  { %s651_s13 = scalar_lea.hbm %s887_s4, 32 }
 0x167   :  { %p652_p9 = scmp.ne.s32.totalorder %s887_s4, %s651_s13  ;;  %p655_p10 = scmp.lt.u32.totalorder %s651_s13, %s887_s4 }
 0x169   :  { %p657_p11 = pnand %p655_p10, %p652_p9 }
 0x16b   :  { %660 = shalt.err (!%p657_p11)
}
 0x16c   :  { %450 = dma.vmem_to_hbm [thread:$0]  %s448_s10, 32, %s887_s4, [#allocation4]  }
 0x16d   :  { %667 = dma.done.wait [#allocation4], 32  }
 0x16e   :  { %668 = vsyncadd [#allocation4], 4294967264 }
 0x16f   :  { %454 = vsyncpa [#allocation3], 1 }
 0x170   :  { %455 = vsyncpa [#allocation6], 1 }
 0x171   :  { %456 = vsyncpa [#allocation9], 1 }
 0x172   :  { %457 = vsyncpa [#allocation4], 1 }

// kernel: tpu_custom_call.1
= control target key start
LH: loop header
LB: loop body
LE: loop exit
PB: predicated region body
PF: predicated region fallthrough
CT: control target
= control target key end

     0   :  { %9 = vsyncpa [#allocation3], 0  ;;  %s883_s0 = inlined_call_operand.hbm [shape: s32[1,1,256], index: 0, kind: input, shape index: {}]   ;;  %s884_s1 = inlined_call_operand.hbm [shape: s32[1,1,256], index: 1, kind: input, shape index: {}]   ;;  %s885_s2 = inlined_call_operand.hbm [shape: bf16[32,40], index: 2, kind: input, shape index: {}]   ;;  %s886_s3 = inlined_call_operand.hbm [shape: bf16[32,100], index: 3, kind: input, shape index: {}]   ;;  %s887_s4 = inlined_call_operand.hbm [shape: f32[1,1,256], index: 4, kind: output, shape index: {}]  }
   0x1   :  { %10 = vsyncpa [#allocation6], 0 }
   0x2   :  { %11 = vsyncpa [#allocation9], 0 }
   0x3   :  { %12 = vsyncpa [#allocation4], 0  ;;  %s669_s15 = smov [#allocation5]   ;;  %s670_s17 = smov [#allocation2]  }
   0x4   :  { %s29_s16 = sshll.u32 %s669_s15, 4  ;;  %s19_s18 = sshll.u32 %s670_s17, 4  ;;  %s30_s16 = int_to_ptr.vmem [resolvable:$true] %s29_s16  ;;  %s20_s18 = int_to_ptr.vmem [resolvable:$true] %s19_s18 }
   0x5   :  { %s551_s21 = scalar_lea.hbm %s884_s1, 32 }
   0x6   :  { %p552_p0 = scmp.ne.s32.totalorder %s884_s1, %s551_s21  ;;  %p555_p1 = scmp.lt.u32.totalorder %s551_s21, %s884_s1 }
   0x8   :  { %p557_p2 = pnand %p555_p1, %p552_p0 }
   0xa   :  { %560 = shalt.err (!%p557_p2)
}
   0xb   :  { %s561_s26 = scalar_lea.vmem %s30_s16, 32  ;;  %p566_p4 = scmp.lt.s32.totalorder %s30_s16, %s30_s16 }
   0xc   :  { %p562_p3 = scmp.ne.s32.totalorder %s30_s16, %s561_s26  ;;  %p567_p5 = scmp.lt.s32.totalorder %s561_s26, %s561_s26 }
   0xe   :  { %p568_p6 = por %p567_p5, %p566_p4 }
  0x10   :  { %p569_p7 = pnand %p568_p6, %p562_p3 }
  0x12   :  { %572 = shalt.err (!%p569_p7)
}
  0x13   :  { %32 = dma.hbm_to_vmem [thread:$0]  %s884_s1, 32, %s30_s16, [#allocation6]  }
  0x14   :  { %s573_s5 = scalar_lea.hbm %s883_s0, 32 }
  0x15   :  { %p574_p8 = scmp.ne.s32.totalorder %s883_s0, %s573_s5  ;;  %p577_p9 = scmp.lt.u32.totalorder %s573_s5, %s883_s0 }
  0x17   :  { %p579_p10 = pnand %p577_p9, %p574_p8 }
  0x19   :  { %582 = shalt.err (!%p579_p10)
}
  0x1a   :  { %s583_s10 = scalar_lea.vmem %s20_s18, 32  ;;  %p588_p12 = scmp.lt.s32.totalorder %s20_s18, %s20_s18 }
  0x1b   :  { %p584_p11 = scmp.ne.s32.totalorder %s20_s18, %s583_s10  ;;  %p589_p13 = scmp.lt.s32.totalorder %s583_s10, %s583_s10 }
  0x1d   :  { %p590_p0 = por %p589_p13, %p588_p12 }
  0x1f   :  { %p591_p1 = pnand %p590_p0, %p584_p11 }
  0x21   :  { %594 = shalt.err (!%p591_p1)
}
  0x22   :  { %22 = dma.hbm_to_vmem [thread:$0]  %s883_s0, 32, %s20_s18, [#allocation3]  }
  0x23   :  { %s671_s12 = smov [#allocation7]   ;;  %s595_s16 = scalar_lea.hbm %s885_s2, 256 }
  0x24   :  { %s38_s13 = sshll.u32 %s671_s12, 4  ;;  %p596_p2 = scmp.ne.s32.totalorder %s885_s2, %s595_s16  ;;  %s39_s13 = int_to_ptr.vmem [resolvable:$true] %s38_s13 }
  0x25   :  { %p599_p3 = scmp.lt.u32.totalorder %s595_s16, %s885_s2 }
  0x27   :  { %p601_p4 = pnand %p599_p3, %p596_p2 }
  0x29   :  { %604 = shalt.err (!%p601_p4)
}
  0x2a   :  { %s605_s22 = scalar_lea.vmem %s39_s13, 256  ;;  %p610_p6 = scmp.lt.s32.totalorder %s39_s13, %s39_s13 }
  0x2b   :  { %p606_p5 = scmp.ne.s32.totalorder %s39_s13, %s605_s22  ;;  %p611_p7 = scmp.lt.s32.totalorder %s605_s22, %s605_s22 }
  0x2d   :  { %p612_p8 = por %p611_p7, %p610_p6 }
  0x2f   :  { %p613_p9 = pnand %p612_p8, %p606_p5 }
  0x31   :  { %616 = shalt.err (!%p613_p9)
}
  0x32   :  { %s672_s0 = smov 64   ;;  %s673_s18 = smov 4  }
  0x33   :  { %44 = dma.hbm_to_vmem [thread:$0]  %s885_s2, 256, %s39_s13, [#allocation6], %s672_s0, %s672_s0, %s673_s18  }
  0x34   :  { %s674_s25 = smov [#allocation8]   ;;  %s617_s29 = scalar_lea.hbm %s886_s3, 256 }
  0x35   :  { %s50_s26 = sshll.u32 %s674_s25, 4  ;;  %p618_p10 = scmp.ne.s32.totalorder %s886_s3, %s617_s29  ;;  %s51_s26 = int_to_ptr.vmem [resolvable:$true] %s50_s26 }
  0x36   :  { %p621_p11 = scmp.lt.u32.totalorder %s617_s29, %s886_s3 }
  0x38   :  { %p623_p12 = pnand %p621_p11, %p618_p10 }
  0x3a   :  { %626 = shalt.err (!%p623_p12)
}
  0x3b   :  { %s627_s8 = scalar_lea.vmem %s51_s26, 256  ;;  %p632_p0 = scmp.lt.s32.totalorder %s51_s26, %s51_s26 }
  0x3c   :  { %p628_p13 = scmp.ne.s32.totalorder %s51_s26, %s627_s8  ;;  %p633_p1 = scmp.lt.s32.totalorder %s627_s8, %s627_s8 }
  0x3e   :  { %p634_p2 = por %p633_p1, %p632_p0 }
  0x40   :  { %p635_p3 = pnand %p634_p2, %p628_p13 }
  0x42   :  { %638 = shalt.err (!%p635_p3)
}
  0x43   :  { %56 = dma.hbm_to_vmem [thread:$0]  %s886_s3, 256, %s51_s26, [#allocation9], %s672_s0, %s672_s0, %s673_s18  }
  0x44   :  { %661 = dma.done.wait [#allocation3], 32  }
  0x45   :  { %662 = vsyncadd [#allocation3], 4294967264 }
  0x46   :  { %663 = dma.done.wait [#allocation6], 288  }
  0x47   :  { %664 = vsyncadd [#allocation6], 4294967008 }
  0x48   :  { %665 = dma.done.wait [#allocation9], 256  }
  0x49   :  { %666 = vsyncadd [#allocation9], 4294967040  ;;  %v72_v0 = vlaneseq  ;;  %v675_v2 = vmov 0   ;;  %v71_v6 = vld [vmem:[#allocation5] sm:$0x3]  ;;  %v677_v24 = vmov 0.0  }
  0x4a   :  { %290 = vmatprep.mubr.bf16.mxu0 %v675_v2  ;;  %371 = vmatprep.mubr.bf16.mxu1 %v675_v2  ;;  %v70_v9 = vld [vmem:[#allocation2] sm:$0x3]  ;;  %v676_v15 = vmov 1.0|1.0   ;;  %v892_v29 = vmov 0  ;;  %v547_v35 = vld [vmem:[#allocation7] sm:$0xff]  }
  0x4b   :  { %v754_v1 = vshrl.u32 %v72_v0, 7  ;;  %v548_v39 = vld [vmem:[#allocation8] sm:$0xff]   ;;  %v549_v40 = vld [vmem:[#allocation7 + $0x8] sm:$0xff]   ;;  %v550_v41 = vld [vmem:[#allocation8 + $0x8] sm:$0xff]   ;;  %s679_s3 = smov [#allocation10]  }
  0x4c   :  { %s447_s10 = sshll.u32 %s679_s3, 4  ;;  %s448_s10 = int_to_ptr.vmem [resolvable:$true] %s447_s10 }
  0x4d   :  { %v84_v3 = vsub.s32 1, %v754_v1  ;;  %v80_v4 = vsub.s32 0, %v754_v1  ;;  %v74_v5 = vadd.s32 8, %v754_v1  ;;  %v762_v7 = vadd.s32 16, %v754_v1  ;;  %s639_s1 = scalar_lea.vmem %s448_s10, 32  ;;  %p644_p5 = scmp.lt.s32.totalorder %s448_s10, %s448_s10 }
  0x4e   :  { %v765_v8 = vadd.s32 24, %v754_v1  ;;  %v77_v12 = vadd.s32 32, %v754_v1  ;;  %v122_v13 = vadd.s32 40, %v754_v1  ;;  %v123_v16 = vadd.s32 48, %v754_v1  ;;  %p640_p4 = scmp.ne.s32.totalorder %s448_s10, %s639_s1  ;;  %p645_p6 = scmp.lt.s32.totalorder %s639_s1, %s639_s1 }
  0x4f   :  { %v767_v10 = vrot.slane %v71_v6, %v84_v3  ;;  %v769_v11 = vrot.slane %v71_v6, %v80_v4  ;;  %v85_v14 = vrot.slane %v70_v9, %v84_v3  ;;  %v124_v17 = vadd.s32 56, %v754_v1 }
  0x50   :  { %v81_v18 = vrot.slane %v70_v9, %v80_v4  ;;  %v125_v19 = vadd.s32 64, %v754_v1  ;;  %v126_v20 = vadd.s32 72, %v754_v1  ;;  %v127_v22 = vadd.s32 80, %v754_v1  ;;  %p646_p7 = por %p645_p6, %p644_p5 }
  0x51   :  { %vm139_vm0 = vcmp.eq.s32.totalorder %v754_v1, %v767_v10  ;;  %vm141_vm1 = vcmp.eq.s32.totalorder %v74_v5, %v767_v10  ;;  %vm138_vm2 = vcmp.eq.s32.totalorder %v754_v1, %v769_v11  ;;  %vm140_vm3 = vcmp.eq.s32.totalorder %v74_v5, %v769_v11 }
  0x52   :  { %vm509_vm4 = vmpackc.low %vm141_vm1, %vm139_vm0  ;;  %vm143_vm5 = vcmp.eq.s32.totalorder %v762_v7, %v767_v10  ;;  %vm145_vm6 = vcmp.eq.s32.totalorder %v765_v8, %v767_v10  ;;  %vm142_vm7 = vcmp.eq.s32.totalorder %v762_v7, %v769_v11  ;;  %vm144_vm8 = vcmp.eq.s32.totalorder %v765_v8, %v769_v11  ;;  %p647_p8 = pnand %p646_p7, %p640_p4 }
  0x53   :  { %510 = vmatprep.subr.msk.bf16.mxu1 %vm509_vm4, %v676_v15  ;;  %vm511_vm9 = vmpackc.low %vm140_vm3, %vm138_vm2  ;;  %vm147_vm10 = vcmp.eq.s32.totalorder %v77_v12, %v767_v10  ;;  %vm149_vm11 = vcmp.eq.s32.totalorder %v122_v13, %v767_v10  ;;  %vm146_vm14 = vcmp.eq.s32.totalorder %v77_v12, %v769_v11  ;;  %vm148_vm15 = vcmp.eq.s32.totalorder %v122_v13, %v769_v11 }
  0x54   :  { %512 = vmatpush1.bf16.msk.msra.mxu1 %vm511_vm9, %v676_v15  ;;  %vm513_vm12 = vmpackc.low %vm145_vm6, %vm143_vm5  ;;  %vm87_vm1 = vcmp.eq.s32.totalorder %v754_v1, %v85_v14  ;;  %vm89_vm2 = vcmp.eq.s32.totalorder %v74_v5, %v85_v14  ;;  %vm151_vm3 = vcmp.eq.s32.totalorder %v123_v16, %v767_v10  ;;  %vm153_vm4 = vcmp.eq.s32.totalorder %v124_v17, %v767_v10 }
  0x55   :  { %514 = vmatprep.subr.msk.bf16.mxu1 %vm513_vm12, %v676_v15  ;;  %vm515_vm13 = vmpackc.low %vm144_vm8, %vm142_vm7  ;;  %vm86_vm6 = vcmp.eq.s32.totalorder %v754_v1, %v81_v18  ;;  %vm88_vm7 = vcmp.eq.s32.totalorder %v74_v5, %v81_v18  ;;  %vm95_vm8 = vcmp.eq.s32.totalorder %v77_v12, %v85_v14  ;;  %vm94_vm12 = vcmp.eq.s32.totalorder %v77_v12, %v81_v18 }
  0x56   :  { %vm517_vm0 = vmpackc.low %vm149_vm11, %vm147_vm10  ;;  %vm150_vm10 = vcmp.eq.s32.totalorder %v123_v16, %v769_v11  ;;  %vm152_vm11 = vcmp.eq.s32.totalorder %v124_v17, %v769_v11  ;;  %v467_v25 = vsel %vm95_vm8, 1.0, %v677_v24  ;;  %v466_v26 = vsel %vm94_vm12, 1.0, %v677_v24 }
  0x57   :  { %vm802_vm5 = vmpackc.low %vm148_vm15, %vm146_vm14  ;;  %vm91_vm14 = vcmp.eq.s32.totalorder %v762_v7, %v85_v14  ;;  %vm93_vm15 = vcmp.eq.s32.totalorder %v765_v8, %v85_v14  ;;  %v128_v27 = vadd.s32 88, %v754_v1  ;;  %v129_v28 = vadd.s32 96, %v754_v1 }
  0x58   :  { %516 = vmatpush1.bf16.msk.msra.mxu1 %vm515_vm13, %v676_v15  ;;  %vm496_vm9 = vmpackc.low %vm89_vm2, %vm87_vm1  ;;  %vm155_vm1 = vcmp.eq.s32.totalorder %v125_v19, %v767_v10  ;;  %vm157_vm2 = vcmp.eq.s32.totalorder %v126_v20, %v767_v10  ;;  %v121_v30 = vpack.c.bf16 %v467_v25, %v467_v25  ;;  %v120_v31 = vpack.c.bf16 %v466_v26, %v466_v26 }
  0x59   :  { %518 = vmatprep.subr.msk.bf16.mxu1 %vm517_vm0, %v676_v15  ;;  %vm813_vm13 = vmpackc.low %vm153_vm4, %vm151_vm3  ;;  %497 = vmatprep.subr.msk.bf16.mxu0 %vm496_vm9, %v676_v15  ;;  %vm90_vm4 = vcmp.eq.s32.totalorder %v762_v7, %v81_v18  ;;  %vm154_vm8 = vcmp.eq.s32.totalorder %v125_v19, %v769_v11  ;;  %vm156_vm9 = vcmp.eq.s32.totalorder %v126_v20, %v769_v11  ;;  %v678_v14 = vmov 1966171168  }
  0x5a   :  { %vm498_vm0 = vmpackc.low %vm88_vm7, %vm86_vm6  ;;  %vm92_vm6 = vcmp.eq.s32.totalorder %v765_v8, %v81_v18  ;;  %vm159_vm12 = vcmp.eq.s32.totalorder %v127_v22, %v767_v10 }
  0x5b   :  { %vm834_vm3 = vmpackc.low %vm152_vm11, %vm150_vm10  ;;  %499 = vmatpush1.bf16.msk.msra.mxu0 %vm498_vm0, %v676_v15  ;;  %vm251_vm10 = vcmask 1043456   ;;  %vm163_vm0 = vcmp.eq.s32.totalorder %v129_v28, %v767_v10 }
  0x5c   :  { %520 = vmatpush1.bf16.msk.msra.mxu1 %vm802_vm5, %v676_v15  ;;  %v893_v29 = vsel %vm834_vm3, 4294967295, %v892_v29  ;;  %vm500_vm5 = vmpackc.low %vm93_vm15, %vm91_vm14  ;;  %vm162_vm3 = vcmp.eq.s32.totalorder %v129_v28, %v769_v11  ;;  %v253_v32 = vsel %vm251_vm10, %v120_v31, 0  ;;  %v493_v33 = vsel %vm163_vm0, 1.0, %v677_v24 }
  0x5d   :  { %522 = vmatprep.subr.msk.bf16.mxu1 %vm813_vm13, %v676_v15  ;;  %vm525_vm7 = vmpackc.low %vm157_vm2, %vm155_vm1  ;;  %501 = vmatprep.subr.msk.bf16.mxu0 %vm500_vm5, %v676_v15  ;;  %vm161_vm13 = vcmp.eq.s32.totalorder %v128_v27, %v767_v10  ;;  %vm894_vm14 = vnez %v893_v29  ;;  %vm158_vm2 = vcmp.eq.s32.totalorder %v127_v22, %v769_v11  ;;  %v492_v34 = vsel %vm162_vm3, 1.0, %v677_v24 }
  0x5e   :  { %vm502_vm11 = vmpackc.low %vm92_vm6, %vm90_vm4  ;;  %vm160_vm4 = vcmp.eq.s32.totalorder %v128_v27, %v769_v11  ;;  %vm244_vm6 = vcmask 326656   ;;  %v229_v36 = vpack.c.bf16 %v493_v33, %v493_v33  ;;  %v228_v37 = vpack.c.bf16 %v492_v34, %v492_v34 }
  0x5f   :  { %503 = vmatpush1.bf16.msk.msra.mxu0 %vm502_vm11, %v676_v15  ;;  %vm527_vm15 = vmpackc.low %vm156_vm9, %vm154_vm8  ;;  %vm325_vm3 = vcmask 818176   ;;  %vm438_vm8 = vcmp.lt.s32.totalorder %v72_v0, 256 }
  0x60   :  { %524 = vmatpush1.bf16.msk.msra.mxu1 %vm894_vm14, %v676_v15  ;;  %504 = vmatprep.subr.msk.bf16.mxu0 %vm251_vm10, %v121_v30  ;;  %vm529_vm1 = vmpackc.low %vm161_vm13, %vm159_vm12 }
  0x61   :  { %526 = vmatprep.subr.msk.bf16.mxu1 %vm525_vm7, %v676_v15  ;;  %vm531_vm5 = vmpackc.low %vm160_vm4, %vm158_vm2  ;;  %vm332_vm7 = vcmask 1041408  }
  0x62   :  { %v334_v38 = vsel %vm332_vm7, %v228_v37, 0 }
  0x63   :  { %263 = vmatpush1.bf16.msra.mxu0 %v253_v32 }
  0x64   :  { %528 = vmatpush1.bf16.msk.msra.mxu1 %vm527_vm15, %v676_v15 }
  0x65   :  { %530 = vmatprep.subr.msk.bf16.mxu1 %vm529_vm1, %v676_v15 }
  0x66   :  { %505 = vmatmul.mubr.msk.bf16.vlgmr.msra.gmra.mrb[0].mxu0 %vm244_vm6, %v547_v35 }
  0x67   :  { %300 = vmatprep.mubr.bf16.mxu0 %v675_v2 }
  0x68   :  { %532 = vmatpush1.bf16.msk.msra.mxu1 %vm531_vm5, %v676_v15  ;;  %v422_v15 = vunpack.c.l.s4 %v678_v14 }
  0x69   :  { %533 = vmatprep.subr.msk.bf16.mxu1 %vm332_vm7, %v229_v36 }
  0x6a   :  { %v423_v20 = vunpack.c.0.s8 %v422_v15 }
  0x6c   :  { %352 = vmatpush1.bf16.msra.mxu1 %v334_v38  ;;  %v426_v25 = vsub.s32 %v423_v20, %v754_v1 }
  0x6e   :  { %506 = vmatmul.mubr.msk.bf16.gmra.mrb[4].mxu0 %vm244_vm6, %v549_v40 }
  0x6f   :  { %534 = vmatmul.mubr.msk.bf16.vlgmr.msra.gmra.mrb[0].mxu1 %vm325_vm3, %v548_v39 }
  0x70   :  { %381 = vmatprep.mubr.bf16.mxu1 %v675_v2 }
  0x77   :  { %535 = vmatmul.mubr.msk.bf16.gmra.mrb[4].mxu1 %vm325_vm3, %v550_v41 }
 0x139   :  { %v292_v42 = vpop.f32.mrb[0].mxu0 }
 0x13a   :  { %v294_v43 = vpop.f32.mrb[1].mxu0 }
 0x13b   :  { %v296_v44 = vpop.f32.mrb[2].mxu0 }
 0x13c   :  { %v298_v45 = vpop.f32.mrb[3].mxu0 }
 0x141   :  { %v302_v47 = vpop.f32.mrb[4].mxu0 }
 0x142   :  { %v373_v46 = vpop.f32.mrb[0].mxu1  ;;  %v304_v50 = vpop.f32.mrb[5].mxu0 }
 0x143   :  { %v392_v48 = vmul.f32 %v373_v46, %v292_v42  ;;  %v375_v49 = vpop.f32.mrb[1].mxu1  ;;  %v306_v53 = vpop.f32.mrb[6].mxu0 }
 0x144   :  { %v393_v51 = vmul.f32 %v375_v49, %v294_v43  ;;  %v377_v52 = vpop.f32.mrb[2].mxu1  ;;  %v308_v56 = vpop.f32.mrb[7].mxu0 }
 0x145   :  { %v394_v54 = vmul.f32 %v377_v52, %v296_v44  ;;  %v379_v55 = vpop.f32.mrb[3].mxu1 }
 0x146   :  { %v395_v57 = vmul.f32 %v379_v55, %v298_v45 }
 0x147   :  { %v400_v58 = vadd.f32 %v394_v54, %v392_v48 }
 0x148   :  { %v409_v59 = vadd.f32 %v395_v57, %v393_v51 }
 0x14a   :  { %v383_v60 = vpop.f32.mrb[4].mxu1 }
 0x14b   :  { %v396_v61 = vmul.f32 %v383_v60, %v302_v47  ;;  %v385_v62 = vpop.f32.mrb[5].mxu1 }
 0x14c   :  { %v397_v63 = vmul.f32 %v385_v62, %v304_v50  ;;  %v387_v2 = vpop.f32.mrb[6].mxu1 }
 0x14d   :  { %v401_v3 = vadd.f32 %v400_v58, %v396_v61  ;;  %v398_v4 = vmul.f32 %v387_v2, %v306_v53  ;;  %v389_v5 = vpop.f32.mrb[7].mxu1 }
 0x14e   :  { %v410_v6 = vadd.f32 %v409_v59, %v397_v63  ;;  %v399_v7 = vmul.f32 %v389_v5, %v308_v56 }
 0x14f   :  { %v402_v8 = vadd.f32 %v401_v3, %v398_v4 }
 0x150   :  { %v411_v9 = vadd.f32 %v410_v6, %v399_v7 }
 0x151   :  { %v403_v10 = vrot.slane %v402_v8, 4 }
 0x152   :  { %v412_v11 = vrot.slane %v411_v9, 4 }
 0x153   :  { %v404_v12 = vadd.f32 %v403_v10, %v402_v8 }
 0x154   :  { %v413_v13 = vadd.f32 %v412_v11, %v411_v9 }
 0x155   :  { %v405_v16 = vrot.slane %v404_v12, 2 }
 0x156   :  { %v414_v17 = vrot.slane %v413_v13, 2 }
 0x157   :  { %v406_v18 = vadd.f32 %v405_v16, %v404_v12 }
 0x158   :  { %v415_v19 = vadd.f32 %v414_v17, %v413_v13 }
 0x159   :  { %v407_v21 = vrot.slane %v406_v18, 1 }
 0x15a   :  { %v416_v22 = vrot.slane %v415_v19, 1 }
 0x15b   :  { %v408_v23 = vadd.f32 %v407_v21, %v406_v18 }
 0x15c   :  { %v417_v24 = vadd.f32 %v416_v22, %v415_v19 }
 0x15e   :  { %v420_v26 = vcombine.low %v408_v23, %v417_v24 }
 0x160   :  { %v427_v27 = vrot.slane %v420_v26, %v426_v25 }
 0x162   :  { %v434_v28 = vrot.slane %v427_v27, %v426_v25 }
 0x164   :  { %440 = vst.msk [vmem:[#allocation10] sm:$0x3] %vm438_vm8, %v434_v28 }
 0x165   :  { %650 = shalt.err (!%p647_p8)
}
 0x166   :  { %s651_s13 = scalar_lea.hbm %s887_s4, 32 }
 0x167   :  { %p652_p9 = scmp.ne.s32.totalorder %s887_s4, %s651_s13  ;;  %p655_p10 = scmp.lt.u32.totalorder %s651_s13, %s887_s4 }
 0x169   :  { %p657_p11 = pnand %p655_p10, %p652_p9 }
 0x16b   :  { %660 = shalt.err (!%p657_p11)
}
 0x16c   :  { %450 = dma.vmem_to_hbm [thread:$0]  %s448_s10, 32, %s887_s4, [#allocation4]  }
 0x16d   :  { %667 = dma.done.wait [#allocation4], 32  }
 0x16e   :  { %668 = vsyncadd [#allocation4], 4294967264 }
 0x16f   :  { %454 = vsyncpa [#allocation3], 1 }
 0x170   :  { %455 = vsyncpa [#allocation6], 1 }
 0x171   :  { %456 = vsyncpa [#allocation9], 1 }
 0x172   :  { %457 = vsyncpa [#allocation4], 1 }

</bundles_post_ra>
